<compile_context>
chip_gen: v7x
topology: tpu7x:2x2x1
jax: 0.10.0
libtpu: 0.0.40
codegen_flags: <defaults>
</compile_context>

<pallas_src>
import functools

import jax
import jax.numpy as jnp
from jax.experimental import pallas as pl
from jax.experimental.pallas import tpu as pltpu

WAIVE_THRESH = 1e-4


def _grad_partial_sums_kernel(y_ref, out_ref, *, dist, thresh, do_l1, do_l2,
                              compute_dtype):
    """Per-block partial sums of relu(|d| - t) / relu(d*d - t^2).

    y_ref:   (TB, H, W) block of the fused (B*C, H, W) input, native dtype.
    out_ref: (1, n_outs, W) f32 block; row k holds the lane-wise partial sum
             of the k-th enabled term (the W-dist-wide terms are zero-padded
             out to W lanes so one dense store covers every row).
    """
    y = y_ref[...].astype(compute_dtype)          # in-kernel (up)cast

    # Finite differences along the two spatial axes (matches Grad._diffs).
    dh = y[:, dist:, :] - y[:, :-dist, :]         # (TB, H-dist, W)
    dw = y[:, :, dist:] - y[:, :, :-dist]         # (TB, H,      W-dist)

    def _lane_partial(v):
        # Reduce the block and sublane axes (f32 accumulation), keep lanes.
        s = jnp.sum(v, axis=1, keepdims=True, dtype=jnp.float32)
        return jnp.sum(s, axis=0, keepdims=True)  # (1, 1, width)

    w = out_ref.shape[-1]
    zeros_tail = jnp.zeros((1, 1, dist), jnp.float32)

    row = 0
    if do_l1:
        vh = jnp.maximum(jnp.abs(dh) - thresh, 0)
        vw = jnp.maximum(jnp.abs(dw) - thresh, 0)
        out_ref[:, row:row + 1, :] = _lane_partial(vh)
        out_ref[:, row + 1:row + 2, :w - dist] = _lane_partial(vw)
        out_ref[:, row + 1:row + 2, w - dist:] = zeros_tail
        row += 2
    if do_l2:
        t2 = thresh * thresh
        vh2 = jnp.maximum(dh * dh - t2, 0)
        vw2 = jnp.maximum(dw * dw - t2, 0)
        out_ref[:, row:row + 1, :] = _lane_partial(vh2)
        out_ref[:, row + 1:row + 2, :w - dist] = _lane_partial(vw2)
        out_ref[:, row + 1:row + 2, w - dist:] = zeros_tail


def _block_footprint_bytes(tb, h, w, in_itemsize, compute_itemsize):
    """Realistic VMEM footprint of one grid step (lane/sublane padded)."""
    hp = -(-h // 8) * 8
    wp = -(-w // 128) * 128
    tile = tb * hp * wp
    # 2x double-buffered input block + ~6 live compute-dtype intermediates
    # (cast copy, slice-diff operand copies, diffs, relu temporaries).
    return 2 * tile * in_itemsize + 6 * tile * compute_itemsize


def _choose_block(bc, h, w, in_itemsize, compute_itemsize, budget_bytes):
    """Largest divisor of bc whose footprint fits, preferring >=2 grid steps
    (so both v7x TensorCores get work); no padding is ever needed."""
    best = 1
    for d in range(1, bc + 1):
        if bc % d:
            continue
        if _block_footprint_bytes(d, h, w, in_itemsize,
                                  compute_itemsize) > budget_bytes:
            continue
        if bc >= 2 and d == bc:
            continue                      # keep at least two grid steps
        best = d
    return best


def grad_loss(y_pred, penalty=("l1",), dist=1, waive_thresh=WAIVE_THRESH,
              compute_dtype=None, vmem_budget_bytes=24 * 1024 * 1024):
    """JAX/Pallas equivalent of Grad.forward(y_pred) for the 'l1'/'l2' path."""
    B, C, H, W = y_pred.shape
    if not (1 <= dist < H and dist < W):
        raise ValueError("dist must satisfy 1 <= dist < min(H, W)")

    do_l1 = "l1" in penalty
    do_l2 = "l2" in penalty
    if not (do_l1 or do_l2):
        # TODO(synk): other penalty branches not implemented.
        return jnp.float32(0.0)

    if compute_dtype is None:
        compute_dtype = jnp.float32       # exact parity with the reference

    BC = B * C
    y = y_pred.reshape(BC, H, W)          # native dtype; no wrapper up-cast

    in_itemsize = jnp.dtype(y.dtype).itemsize
    comp_itemsize = jnp.dtype(compute_dtype).itemsize
    tb = _choose_block(BC, H, W, in_itemsize, comp_itemsize, vmem_budget_bytes)
    nb = BC // tb                          # exact: tb divides BC, no padding

    n_outs = 2 * (int(do_l1) + int(do_l2))

    footprint = _block_footprint_bytes(tb, H, W, in_itemsize, comp_itemsize)
    vmem_limit = int(min(64 * 2 ** 20, max(32 * 2 ** 20, 2 * footprint)))

    kernel = functools.partial(
        _grad_partial_sums_kernel, dist=dist, thresh=float(waive_thresh),
        do_l1=do_l1, do_l2=do_l2, compute_dtype=compute_dtype)

    sums = pl.pallas_call(
        kernel,
        out_shape=jax.ShapeDtypeStruct((nb, n_outs, W), jnp.float32),
        grid_spec=pltpu.PrefetchScalarGridSpec(
            num_scalar_prefetch=0,
            grid=(nb,),
            in_specs=[pl.BlockSpec((tb, H, W), lambda i: (i, 0, 0))],
            out_specs=pl.BlockSpec((1, n_outs, W), lambda i: (i, 0, 0)),
        ),
        compiler_params=pltpu.CompilerParams(
            dimension_semantics=("parallel",),   # megacore sharding on v7x
            vmem_limit_bytes=vmem_limit,
        ),
    )(y)

    # One tiny wrapper reduction over (block, lane); rows stay separated.
    per_term = jnp.sum(sums, axis=(0, 2))        # (n_outs,), f32

    n_h = BC * (H - dist) * W                    # element count of the H-diff
    n_w = BC * H * (W - dist)                    # element count of the W-diff

    reg_loss = jnp.float32(0.0)
    i = 0
    if do_l1:
        reg_loss = reg_loss + 0.5 * (per_term[i] / n_h + per_term[i + 1] / n_w)
        i += 2
    if do_l2:
        reg_loss = reg_loss + jnp.sqrt(
            0.5 * (per_term[i] / n_h + per_term[i + 1] / n_w))
    return reg_loss


def _grad_loss_ref(y_pred, penalty=("l1",), dist=1, waive_thresh=WAIVE_THRESH):
    """Pure-JAX reference (mirrors the PyTorch forward)."""
    y = y_pred.astype(jnp.float32)
    dh = y[:, :, dist:, :] - y[:, :, :-dist, :]
    dw = y[:, :, :, dist:] - y[:, :, :, :-dist]
    loss = jnp.float32(0.0)
    if "l1" in penalty:
        df = [jnp.mean(jnp.maximum(jnp.abs(f) - waive_thresh, 0.0))
              for f in (dh, dw)]
        loss = loss + sum(df) / len(df)
    if "l2" in penalty:
        df = [jnp.mean(jnp.maximum(f * f - waive_thresh ** 2, 0.0))
              for f in (dh, dw)]
        loss = loss + jnp.sqrt(sum(df) / len(df))
    return loss


if __name__ == "__main__":
    key = jax.random.PRNGKey(0)
    # B=2, C=2 (ndims=2 displacement field), H=W=16
    B, C, H, W = 2, 2, 16, 16
    y_pred = 0.05 * jax.random.normal(key, (B, C, H, W), dtype=jnp.float32)

    # Default 'l1' path.
    loss = jax.block_until_ready(grad_loss(y_pred, penalty=("l1",)))
    ref = _grad_loss_ref(y_pred, penalty=("l1",))
    assert jnp.allclose(loss, ref, rtol=1e-5, atol=1e-6), (loss, ref)

    # 'l1' + 'l2' branch sharing the same kernel.
    loss_l12 = jax.block_until_ready(grad_loss(y_pred, penalty=("l1", "l2")))
    ref_l12 = _grad_loss_ref(y_pred, penalty=("l1", "l2"))
    assert jnp.allclose(loss_l12, ref_l12, rtol=1e-5, atol=1e-6), (loss_l12, ref_l12)

    # bf16 input, f32 compute (in-kernel upcast; no wrapper-side cast).
    y_bf16 = y_pred.astype(jnp.bfloat16)
    loss_bf = jax.block_until_ready(grad_loss(y_bf16, penalty=("l1",)))
    ref_bf = _grad_loss_ref(y_bf16, penalty=("l1",))
    assert jnp.allclose(loss_bf, ref_bf, rtol=1e-5, atol=1e-6), (loss_bf, ref_bf)

    # bf16 input, bf16 compute (v7x VALU-friendly path; looser tolerance).
    loss_bf_fast = jax.block_until_ready(
        grad_loss(y_bf16, penalty=("l1",), compute_dtype=jnp.bfloat16))
    assert jnp.allclose(loss_bf_fast, ref_bf, rtol=3e-2, atol=1e-4), (
        loss_bf_fast, ref_bf)

    print("KERNEL_OK")
</pallas_src>

<mosaic_0001>
module attributes {stable_mosaic.version = 11 : i64} {
  func.func @_grad_partial_sums_kernel(%arg0: i32, %arg1: memref<2x16x16xf32, #tpu.memory_space<vmem>>, %arg2: memref<1x2x16xf32, #tpu.memory_space<vmem>>) attributes {dimension_semantics = [#tpu.dimension_semantics<parallel>], iteration_bounds = array<i64: 2>, scalar_prefetch = 0 : i64, scratch_operands = 0 : i64, tpu.core_type = #tpu.core_type<tc>, window_params = [{transform_indices = @transform_0, window_bounds = array<i64: 2, 16, 16>}, {transform_indices = @transform_1, window_bounds = array<i64: 1, 2, 16>}]} {
    %c0 = arith.constant 0 : index
    %c0_0 = arith.constant 0 : index
    %c0_1 = arith.constant 0 : index
    %0 = vector.load %arg1[%c0, %c0_0, %c0_1] : memref<2x16x16xf32, #tpu.memory_space<vmem>>, vector<2x16x16xf32>
    %1 = vector.extract_strided_slice %0 {offsets = [0, 1, 0], sizes = [2, 15, 16], strides = [1, 1, 1]} : vector<2x16x16xf32> to vector<2x15x16xf32>
    %2 = vector.extract_strided_slice %0 {offsets = [0, 0, 0], sizes = [2, 15, 16], strides = [1, 1, 1]} : vector<2x16x16xf32> to vector<2x15x16xf32>
    %3 = arith.subf %1, %2 : vector<2x15x16xf32>
    %4 = vector.extract_strided_slice %0 {offsets = [0, 0, 1], sizes = [2, 16, 15], strides = [1, 1, 1]} : vector<2x16x16xf32> to vector<2x16x15xf32>
    %5 = vector.extract_strided_slice %0 {offsets = [0, 0, 0], sizes = [2, 16, 15], strides = [1, 1, 1]} : vector<2x16x16xf32> to vector<2x16x15xf32>
    %6 = arith.subf %4, %5 : vector<2x16x15xf32>
    %cst = arith.constant 0.000000e+00 : f32
    %7 = vector.broadcast %cst : f32 to vector<1x1x1xf32>
    %8 = math.absf %3 : vector<2x15x16xf32>
    %cst_2 = arith.constant 9.99999974E-5 : f32
    %9 = vector.broadcast %cst_2 : f32 to vector<2x15x16xf32>
    %10 = arith.subf %8, %9 : vector<2x15x16xf32>
    %cst_3 = arith.constant 0.000000e+00 : f32
    %11 = vector.broadcast %cst_3 : f32 to vector<2x15x16xf32>
    %12 = arith.maximumf %10, %11 : vector<2x15x16xf32>
    %13 = math.absf %6 : vector<2x16x15xf32>
    %cst_4 = arith.constant 9.99999974E-5 : f32
    %14 = vector.broadcast %cst_4 : f32 to vector<2x16x15xf32>
    %15 = arith.subf %13, %14 : vector<2x16x15xf32>
    %cst_5 = arith.constant 0.000000e+00 : f32
    %16 = vector.broadcast %cst_5 : f32 to vector<2x16x15xf32>
    %17 = arith.maximumf %15, %16 : vector<2x16x15xf32>
    %cst_6 = arith.constant dense<0.000000e+00> : vector<2x16xf32>
    %18 = vector.multi_reduction <add>, %12, %cst_6 [1] : vector<2x15x16xf32> to vector<2x16xf32>
    %19 = vector.shape_cast %18 : vector<2x16xf32> to vector<2x1x16xf32>
    %cst_7 = arith.constant dense<0.000000e+00> : vector<1x16xf32>
    %20 = vector.multi_reduction <add>, %19, %cst_7 [0] : vector<2x1x16xf32> to vector<1x16xf32>
    %21 = vector.shape_cast %20 : vector<1x16xf32> to vector<1x1x16xf32>
    %c0_8 = arith.constant 0 : index
    %c0_9 = arith.constant 0 : index
    %c0_10 = arith.constant 0 : index
    %22 = vector.load %arg2[%c0_8, %c0_9, %c0_10] : memref<1x2x16xf32, #tpu.memory_space<vmem>>, vector<1x1x16xf32>
    tpu.vector_store %arg2[%c0_8, %c0_9, %c0_10], %21 {strides = array<i32>} : memref<1x2x16xf32, #tpu.memory_space<vmem>>, vector<1x1x16xf32>,
    %cst_11 = arith.constant dense<0.000000e+00> : vector<2x15xf32>
    %23 = vector.multi_reduction <add>, %17, %cst_11 [1] : vector<2x16x15xf32> to vector<2x15xf32>
    %24 = vector.shape_cast %23 : vector<2x15xf32> to vector<2x1x15xf32>
    %cst_12 = arith.constant dense<0.000000e+00> : vector<1x15xf32>
    %25 = vector.multi_reduction <add>, %24, %cst_12 [0] : vector<2x1x15xf32> to vector<1x15xf32>
    %26 = vector.shape_cast %25 : vector<1x15xf32> to vector<1x1x15xf32>
    %c0_13 = arith.constant 0 : index
    %c1 = arith.constant 1 : index
    %c0_14 = arith.constant 0 : index
    %27 = vector.load %arg2[%c0_13, %c1, %c0_14] : memref<1x2x16xf32, #tpu.memory_space<vmem>>, vector<1x1x15xf32>
    tpu.vector_store %arg2[%c0_13, %c1, %c0_14], %26 {strides = array<i32>} : memref<1x2x16xf32, #tpu.memory_space<vmem>>, vector<1x1x15xf32>,
    %c0_15 = arith.constant 0 : index
    %c1_16 = arith.constant 1 : index
    %c15 = arith.constant 15 : index
    %28 = vector.load %arg2[%c0_15, %c1_16, %c15] : memref<1x2x16xf32, #tpu.memory_space<vmem>>, vector<1x1x1xf32>
    tpu.vector_store %arg2[%c0_15, %c1_16, %c15], %7 {strides = array<i32>} : memref<1x2x16xf32, #tpu.memory_space<vmem>>, vector<1x1x1xf32>,
    return
  }
  func.func @transform_0(%arg0: i32) -> (i32, i32, i32) {
    %c0_i32 = arith.constant 0 : i32
    %c0_i32_0 = arith.constant 0 : i32
    %c0_i32_1 = arith.constant 0 : i32
    return %arg0, %c0_i32, %c0_i32_0 : i32, i32, i32
  }
  func.func @transform_1(%arg0: i32) -> (i32, i32, i32) {
    %c0_i32 = arith.constant 0 : i32
    %c0_i32_0 = arith.constant 0 : i32
    %c0_i32_1 = arith.constant 0 : i32
    return %arg0, %c0_i32, %c0_i32_0 : i32, i32, i32
  }
}

</mosaic_0001>

<bundles_post_ra>
// kernel: tpu_custom_call.1
= control target key start
LH: loop header
LB: loop body
LE: loop exit
PB: predicated region body
PF: predicated region fallthrough
CT: control target
= control target key end

     0   :  { %6 = vsyncpa [#allocation3], 0  ;;  %s715_s0 = inlined_call_operand.hbm [shape: f32[4,16,16], index: 0, kind: input, shape index: {}]   ;;  %s716_s1 = inlined_call_operand.hbm [shape: f32[2,2,16], index: 1, kind: output, shape index: {}]  }
   0x1   :  { %8 = vsyncpa [#allocation3 + $0x1], 0 }
   0x2   :  { %9 = vsyncpa [#allocation4], 0 }
   0x3   :  { %11 = vsyncpa [#allocation4 + $0x1], 0  ;;  %s544_s6 = smov 0   ;;  %s546_s7 = smov 0  }
   0x4   :  { %s548_s8 = smov 0   ;;  %s550_s9 = smov 0  }
   0x5 LB: > { %s565_s10 = sadd.s32 4294967295, %s525_s9   ;;  %s354_s11 = sadd.s32 4294967294, %s525_s9   ;;  %s525_s9 = sphi %s550_s9, %s729_s9   ;;  %s521_s8 = sphi %s548_s8, %s728_s8   ;;  %s517_s7 = sphi %s546_s7, %s727_s7   ;;  %s513_s6 = sphi %s544_s6, %s726_s6  }
   0x6   : > { %s569_s12 = sadd.s32 1, %s525_s9   ;;  %s24_s13 = sadd.s32 1, %s521_s8 }
   0x7   : > { %s21_s14 = ssub.s32 %s525_s9, %s569_s12  ;;  %p31_p0 = scmp.ne.s32.totalorder %s521_s8, %s517_s7 }
   0x8   : > { %p22_p1 = scmp.eq.s32.totalorder %s21_s14, 0  ;;  %p32_p2 = scmp.eq.s32.totalorder %s525_s9, 0 }
   0x9   : > { %p37_p3 = scmp.ne.s32.totalorder %s517_s7, %s513_s6  ;;  %p38_p4 = scmp.eq.s32.totalorder %s565_s10, 0 }
   0xa   : > { %s581_s15 = scalar_select %p22_p1, %s521_s8, %s24_s13  }
   0xb   : > { %p583_p5 = por %p32_p2, %p31_p0  ;;  %p587_p6 = por %p38_p4, %p37_p3 }
   0xc   : > { %p61_p7 = scmp.eq.s32.totalorder %s565_s10, 1  ;;  %p67_p8 = scmp.eq.s32.totalorder %s354_s11, 1 }
   0xd   : > { %p390_p10 = scmp.lt.s32.totalorder %s525_s9, 2  ;;  %s87_s20 = sand.u32 1, %s521_s8  }
   0xe   : > { %p594_p11 = por %p61_p7, %p31_p0  ;;  %p598_p12 = por %p67_p8, %p37_p3 }
   0xf   : > { %s377_s21 = sshll.u32 %s525_s9, 9  ;;  %s357_s22 = sshll.u32 %s87_s20, 5 }
  0x10   : > { %s720_s18 = scalar_select %p594_p11, 1, 0 }
  0x11   : > { %s721_s19 = scalar_select %p598_p12, 1, 0 }
  0x12   : > { %s607_s25 = scalar_lea.hbm %s715_s0, %s377_s21  ;;  %s91_s26 = scalar_lea.vmem [#allocation2], %s357_s22 }
  0x13   : > { %s99_s27 = sshll.u32 %s91_s26, 4  ;;  %p611_p13 = pnand %p390_p10, %p583_p5  ;;  %s615_s27 = int_to_ptr.vmem [resolvable:$true] %s99_s27 }
  0x14   : > { %s617_s29 = scalar_lea.sflag [#allocation3], %s87_s20  ;;  %s429_s30 = scalar_lea.hbm %s607_s25, 512 }
  0x15   : > { %p430_p0 = scmp.ne.s32.totalorder %s607_s25, %s429_s30  ;;  %p431_p1 = pneg %p611_p13 }
  0x16   : > { %s434_s4 = scalar_lea.hbm %s715_s0, 1024  ;;  %p435_p4 = scmp.lt.u32.totalorder %s607_s25, %s715_s0 }
  0x17   : > { %p432_p2 = pnand %p431_p1, %p430_p0  ;;  %p436_p5 = scmp.lt.u32.totalorder %s434_s4, %s429_s30 }
  0x18   : > { %p438_p8 = scmp.lt.u32.totalorder %s429_s30, %s607_s25 }
  0x19   : > { %p433_p3 = pneg %p432_p2  ;;  %p437_p7 = por %p436_p5, %p435_p4 }
  0x1b   : > { %p439_p10 = por %p438_p8, %p437_p7 }
  0x1d   : > { %p440_p9 = pnand %p439_p10, %p433_p3 }
  0x1f   : > { %443 = shalt.err (!%p440_p9)
}
  0x20   : > { %s444_s13 = scalar_lea.vmem %s615_s27, 512  ;;  %s527_s14 = smov [#allocation2]  }
  0x21   : > { %p445_p0 = scmp.ne.s32.totalorder %s615_s27, %s444_s13  ;;  %s449_s16 = sshll.u32 %s527_s14, 4  ;;  %s450_s16 = int_to_ptr.vmem [resolvable:$false] %s449_s16 }
  0x22   : > { %s451_s20 = scalar_lea.vmem %s450_s16, 1024  ;;  %p452_p11 = scmp.lt.s32.totalorder %s615_s27, %s450_s16 }
  0x23   : > { %p447_p2 = pnand %p445_p0, %p431_p1  ;;  %p453_p4 = scmp.lt.s32.totalorder %s451_s20, %s444_s13 }
  0x25   : > { %p448_p12 = pneg %p447_p2  ;;  %p454_p5 = por %p453_p4, %p452_p11 }
  0x27   : > { %p455_p7 = pnand %p454_p5, %p448_p12 }
  0x29   : > { %458 = shalt.err (!%p455_p7)
}
  0x2a   : > { %s528_s21 = smov 128   ;;  %s529_s22 = smov 8  }
  0x2b   : > { %385 = dma.hbm_to_vmem [thread:$0]  (!%p611_p13), %s607_s25, 512, %s615_s27, %s617_s29, %s528_s21, %s528_s21, %s529_s22  }
  0x2c   : > { %p361_p9 = scmp.ge.s32.totalorder %s525_s9, 1  ;;  %p107_p1 = scmp.lt.s32.totalorder %s525_s9, 3 }
  0x2e   : > { %p108_p3 = pnand %p361_p9, %p107_p1 }
  0x2f   : > { %s648_s23 = sand.u32 (!%p108_p3), 1, %s517_s7  }
  0x30   : > { %111 = sbr.rel (%p108_p3) target bundleno = 332 (0x14c), region = 24  ;;  %s362_s24 = sshll.u32 (!%p108_p3), %s648_s23, 5 }
  0x31   : > { %s114_s26 = scalar_lea.sflag (!%p108_p3), [#allocation3], %s648_s23  ;;  %s117_s30 = scalar_lea.vmem (!%p108_p3), [#allocation2], %s362_s24 }
  0x37   : > { %504 = dma.done.wait (%p587_p6), %s114_s26, 512  }
  0x38   : > { %506 = vsyncadd (%p587_p6), %s114_s26, 4294966784  ;;  %v139_v0 = vld [vmem:[%s117_s30 + $0x10] sm:$0xff]  ;;  %v137_v1 = vld [vmem:[%s117_s30] sm:$0xff]  ;;  %s530_s25 = smov 1   ;;  %vm145_vm0 = vcmask 1040384   ;;  %vm204_vm1 = vcmask 1046528  }
  0x39   : > { %164 = vrot.lane.b32.xlu1 %v139_v0, %s530_s25  ;;  %160 = vrot.lane.b32.xlu0 %v137_v1, %s530_s25  ;;  %v140_v2 = vld [vmem:[%s117_s30 + $0x18] sm:$0xff]  ;;  %v138_v3 = vld [vmem:[%s117_s30 + $0x8] sm:$0xff]  ;;  %v149_v4 = vrot.slane %v139_v0, 7  ;;  %v146_v5 = vrot.slane %v137_v1, 7  ;;  %vm215_vm2 = vcmask 130048   ;;  %vm217_vm3 = vcmask 129024  }
  0x3a   : > { %v150_v6 = vrot.slane %v140_v2, 7  ;;  %v147_v7 = vrot.slane %v138_v3, 7  ;;  %vm240_vm4 = vcmask 130056   ;;  %s363_s17 = sshll.u32 %s648_s23, 1  ;;  %vm238_vm5 = vcmask 122880   ;;  %s531_s28 = smov 127  }
  0x3b   : > { %v158_v10 = vsub.f32 %v139_v0, %v149_v4  ;;  %v156_v11 = vsub.f32 %v137_v1, %v146_v5  ;;  %s135_s27 = scalar_lea.vmem [#allocation5], %s363_s17  ;;  %s373_s29 = sshll.u32 %s565_s10, 5  ;;  %vm266_vm6 = vcmask 114688   ;;  %vm268_vm7 = vcmask 123000  }
  0x3c   : > { %v151_v8 = vsel %vm145_vm0, %v149_v4, %v150_v6  ;;  %v148_v9 = vsel %vm145_vm0, %v146_v5, %v147_v7  ;;  %s284_s2 = sshll.u32 %s135_s27, 4  ;;  %s671_s5 = scalar_lea.hbm %s716_s1, %s373_s29  ;;  %s673_s2 = int_to_ptr.vmem [resolvable:$true] %s284_s2 }
  0x3d   : > { %166 = vrot.lane.b32.xlu1 %v140_v2, %s530_s25  ;;  %162 = vrot.lane.b32.xlu0 %v138_v3, %s530_s25  ;;  %v159_v12 = vsub.f32 %v140_v2, %v151_v8  ;;  %v157_v13 = vsub.f32 %v138_v3, %v148_v9  ;;  %v178_v14 = vand.u32 2147483647, %v158_v10  ;;  %v176_v15 = vand.u32 2147483647, %v156_v11  ;;  %s271_s11 = scalar_lea.sflag [#allocation4], %s648_s23  ;;  %s459_s13 = scalar_lea.vmem %s673_s2, 32 }
  0x3e   : > { %p460_p6 = scmp.ne.s32.totalorder %s673_s2, %s459_s13  ;;  %p723_p11 = scmp.ne.s32.totalorder %s720_s18, 0 }
  0x3f   : > { %v179_v16 = vand.u32 2147483647, %v159_v12  ;;  %v177_v17 = vand.u32 2147483647, %v157_v13  ;;  %v366_v18 = vadd.f32 -0.0001, %v178_v14 }
  0x40   : > { %v364_v19 = vadd.f32 -0.0001, %v176_v15  ;;  %p461_p12 = pnand %p460_p6, %p723_p11  ;;  %s533_s10 = smov [#allocation5]  }
  0x41   : > { %v367_v20 = vadd.f32 -0.0001, %v179_v16  ;;  %v365_v21 = vadd.f32 -0.0001, %v177_v17  ;;  %v186_v22 = vmax.f32 %v366_v18, 0.0  ;;  %s463_s14 = sshll.u32 %s533_s10, 4  ;;  %s464_s14 = int_to_ptr.vmem [resolvable:$false] %s463_s14 }
  0x42   : > { %v184_v23 = vmax.f32 %v364_v19, 0.0  ;;  %p462_p13 = pneg %p461_p12  ;;  %s465_s16 = scalar_lea.vmem %s464_s14, 64 }
  0x43   : > { %v187_v24 = vmax.f32 %v367_v20, 0.0  ;;  %v185_v25 = vmax.f32 %v365_v21, 0.0  ;;  %v208_v26 = vrot.slane %v186_v22, 1  ;;  %p466_p8 = scmp.lt.s32.totalorder %s673_s2, %s464_s14  ;;  %p467_p10 = scmp.lt.s32.totalorder %s465_s16, %s459_s13 }
  0x44   : > { %v205_v27 = vrot.slane %v184_v23, 1 }
  0x45   : > { %v209_v28 = vrot.slane %v187_v24, 1  ;;  %v206_v29 = vrot.slane %v185_v25, 1  ;;  %p468_p0 = por %p467_p10, %p466_p8 }
  0x47   : > { %v210_v30 = vsel %vm204_vm1, %v208_v26, %v209_v28  ;;  %v207_v31 = vsel %vm204_vm1, %v205_v27, %v206_v29  ;;  %v227_v33 = vsel %vm217_vm3, %v209_v28, 0.0  ;;  %v218_v35 = vsel %vm217_vm3, %v206_v29, 0.0  ;;  %p469_p2 = pnand %p468_p0, %p462_p13 }
  0x48   : > { %v226_v32 = vsel %vm215_vm2, %v210_v30, 0.0  ;;  %v216_v34 = vsel %vm215_vm2, %v207_v31, 0.0  ;;  %v532_v31 = vmov 0.0  }
  0x49   : > { %v228_v36 = vadd.f32 %v227_v33, %v226_v32  ;;  %v219_v37 = vadd.f32 %v218_v35, %v216_v34 }
  0x4b   : > { %v229_v38 = vrot.slane %v228_v36, 4  ;;  %v220_v39 = vrot.slane %v219_v37, 4 }
  0x4d   : > { %v230_v40 = vadd.f32 %v229_v38, %v228_v36  ;;  %v221_v41 = vadd.f32 %v220_v39, %v219_v37 }
  0x4f   : > { %v231_v42 = vrot.slane %v230_v40, 2  ;;  %v222_v43 = vrot.slane %v221_v41, 2 }
  0x51   : > { %v232_v50 = vadd.f32 %v231_v42, %v230_v40  ;;  %v223_v51 = vadd.f32 %v222_v43, %v221_v41 }
  0x53   : > { %v233_v60 = vrot.slane %v232_v50, 1  ;;  %v224_v61 = vrot.slane %v223_v51, 1 }
  0x55   : > { %v234_v6 = vadd.f32 %v233_v60, %v232_v50  ;;  %v225_v7 = vadd.f32 %v224_v61, %v223_v51 }
  0x57   : > { %v235_v14 = vsel %vm215_vm2, %v225_v7, 0.0  ;;  %v236_v15 = vsel %vm215_vm2, %v234_v6, 0.0 }
  0x58   : > { %v237_v16 = vadd.f32 %v236_v15, %v235_v14 }
  0x5a   : > { %239 = vst.msk [vmem:[%s135_s27] sm:$0x1] %vm238_vm5, %v237_v16 }
  0xab   : > { %v165_v44 = vpop.permute.xlu1 %164  ;;  %v161_v45 = vpop.permute.xlu0 %160 }
  0xac   : > { %v174_v46 = vsub.f32 %v139_v0, %v165_v44  ;;  %v172_v47 = vsub.f32 %v137_v1, %v161_v45 }
  0xae   : > { %v190_v48 = vand.u32 2147483647, %v174_v46  ;;  %v188_v49 = vand.u32 2147483647, %v172_v47 }
  0xaf   : > { %v167_v52 = vpop.permute.xlu1 %166  ;;  %v163_v53 = vpop.permute.xlu0 %162 }
  0xb0   : > { %v370_v54 = vadd.f32 -0.0001, %v190_v48  ;;  %v368_v55 = vadd.f32 -0.0001, %v188_v49  ;;  %v175_v56 = vsub.f32 %v140_v2, %v167_v52  ;;  %v173_v57 = vsub.f32 %v138_v3, %v163_v53 }
  0xb2   : > { %v191_v58 = vand.u32 2147483647, %v175_v56  ;;  %v189_v59 = vand.u32 2147483647, %v173_v57  ;;  %v198_v62 = vmax.f32 %v370_v54, 0.0  ;;  %v196_v63 = vmax.f32 %v368_v55, 0.0 }
  0xb4   : > { %v371_v4 = vadd.f32 -0.0001, %v191_v58  ;;  %v369_v0 = vadd.f32 -0.0001, %v189_v59  ;;  %v250_v8 = vsel %vm240_vm4, %v198_v62, 0.0  ;;  %v241_v9 = vsel %vm240_vm4, %v196_v63, 0.0 }
  0xb6   : > { %v199_v1 = vmax.f32 %v371_v4, 0.0  ;;  %v197_v5 = vmax.f32 %v369_v0, 0.0 }
  0xb8   : > { %v251_v2 = vsel %vm240_vm4, %v199_v1, 0.0  ;;  %v242_v3 = vsel %vm240_vm4, %v197_v5, 0.0 }
  0xb9   : > { %v252_v10 = vadd.f32 %v251_v2, %v250_v8  ;;  %v243_v11 = vadd.f32 %v242_v3, %v241_v9 }
  0xbb   : > { %v253_v12 = vrot.slane %v252_v10, 4  ;;  %v244_v13 = vrot.slane %v243_v11, 4 }
  0xbd   : > { %v254_v17 = vadd.f32 %v253_v12, %v252_v10  ;;  %v245_v18 = vadd.f32 %v244_v13, %v243_v11 }
  0xbf   : > { %v255_v19 = vrot.slane %v254_v17, 2  ;;  %v246_v20 = vrot.slane %v245_v18, 2 }
  0xc1   : > { %v247_v21 = vadd.f32 %v246_v20, %v245_v18  ;;  %v256_v22 = vadd.f32 %v255_v19, %v254_v17 }
  0xc3   : > { %v248_v23 = vrot.slane %v247_v21, 1  ;;  %v257_v24 = vrot.slane %v256_v22, 1 }
  0xc5   : > { %v249_v25 = vadd.f32 %v248_v23, %v247_v21  ;;  %v258_v26 = vadd.f32 %v257_v24, %v256_v22 }
  0xc7   : > { %v259_v27 = vsel %vm240_vm4, %v249_v25, 0.0  ;;  %v260_v28 = vsel %vm240_vm4, %v258_v26, 0.0 }
  0xc8   : > { %v261_v29 = vadd.f32 %v260_v28, %v259_v27 }
  0xca   : > { %263 = vrot.lane.b32.xlu0 %v261_v29, %s531_s28 }
 0x13c   : > { %v264_v30 = vpop.permute.xlu0 %263 }
 0x13d   : > { %267 = vst.msk [vmem:[%s135_s27 + $0x1] sm:$0x1] %vm266_vm6, %v264_v30 }
 0x13e   : > { %269 = vst.msk [vmem:[%s135_s27 + $0x1] sm:$0x1] %vm268_vm7, %v532_v31 }
 0x13f   : > { %472 = shalt.err (!%p469_p2)
}
 0x140   : > { %s473_s20 = scalar_lea.hbm %s671_s5, 32  ;;  %s477_s23 = scalar_lea.hbm %s716_s1, 64 }
 0x141   : > { %p474_p4 = scmp.ne.s32.totalorder %s671_s5, %s473_s20  ;;  %p478_p9 = scmp.lt.u32.totalorder %s671_s5, %s716_s1 }
 0x142   : > { %p479_p1 = scmp.lt.u32.totalorder %s477_s23, %s473_s20  ;;  %p481_p6 = scmp.lt.u32.totalorder %s473_s20, %s671_s5 }
 0x143   : > { %p475_p5 = pnand %p474_p4, %p723_p11 }
 0x144   : > { %p480_p3 = por %p479_p1, %p478_p9 }
 0x145   : > { %p476_p7 = pneg %p475_p5 }
 0x146   : > { %p482_p12 = por %p481_p6, %p480_p3 }
 0x148   : > { %p483_p13 = pnand %p482_p12, %p476_p7 }
 0x14a   : > { %486 = shalt.err (!%p483_p13)
}
 0x14b   : > { %380 = dma.vmem_to_hbm [thread:$0]  (%p723_p11), %s673_s2, 32, %s671_s5, %s271_s11  }
 0x14c PF: > { %s296_s30 = sand.u32 1, %s513_s6   ;;  %p724_p8 = scmp.ne.s32.totalorder %s721_s19, 0 }
 0x14d   : > { %p725_p10 = scmp.ge.s32.totalorder %s525_s9, 2  ;;  %s297_s25 = scalar_lea.sflag [#allocation4], %s296_s30 }
 0x14f   : > { %p387_p0 = pnand %p725_p10, %p724_p8 }
 0x151   : > { %508 = dma.done.wait (!%p387_p0), %s297_s25, 32  }
 0x152   : > { %510 = vsyncadd (!%p387_p0), %s297_s25, 4294967264  ;;  %p14_p2 = scmp.ge.s32.totalorder %s569_s12, 4   ;;  %s726_s6 = smov %s517_s7 }
 0x153   : > { %s727_s7 = smov %s521_s8  ;;  %s728_s8 = smov %s581_s15 }
 0x154   : > { %s729_s9 = smov %s569_s12  ;;  %16 = sbr.rel (!%p14_p2) target bundleno = 5 (0x5), region = 69 }
 0x15b   :  { %302 = vsyncpa [#allocation3], 1 }
 0x15c   :  { %304 = vsyncpa [#allocation3 + $0x1], 1 }
 0x15d   :  { %305 = vsyncpa [#allocation4], 1 }
 0x15e   :  { %307 = vsyncpa [#allocation4 + $0x1], 1 }

</bundles_post_ra>
